<compile_context>
chip_gen: v7x
topology: tpu7x:2x2x1
jax: 0.10.0
libtpu: 0.0.40
codegen_flags: <defaults>
</compile_context>

<pallas_src>
import functools
import math

import jax
import jax.numpy as jnp
from jax import lax
from jax.experimental import pallas as pl
from jax.experimental.pallas import tpu as pltpu


# --------------------------------------------------------------------------- #
# Kernel
# --------------------------------------------------------------------------- #
def self_attention_kernel(
    x_ref,       # (bs, tk)   f32   K-slice of flattened input tokens
    wqkv_ref,    # (tk, 3E)   bf16  fused in-proj slice (scale folded into Q cols)
    bqkv_ref,    # (1, 3E)    f32   fused in-proj bias  (scale folded into Q part)
    wf_ref,      # (E, Cp)    bf16  fused out_proj @ classifier (padded to 128 lanes)
    bf_ref,      # (1, Cp)    f32
    out_ref,     # (bs, Cp)   f32
    qkv_acc,     # (bs, 3E)   f32   VMEM scratch accumulator
    *,
    embed_dim,
):
    k_idx = pl.program_id(0)
    nk = pl.num_programs(0)

    @pl.when(k_idx == 0)
    def _():
        qkv_acc[...] = jnp.zeros_like(qkv_acc)

    # Streamed K-tile of the fused QKV projection: bf16 MXU operands, f32 acc.
    qkv_acc[...] += jnp.dot(
        x_ref[...].astype(jnp.bfloat16),
        wqkv_ref[...],
        preferred_element_type=jnp.float32,
    )

    @pl.when(k_idx == nk - 1)
    def _():
        E = embed_dim
        qkv = qkv_acc[...] + bqkv_ref[...]
        q = qkv[:, :E]            # scale already folded into the weights
        k = qkv[:, E:2 * E]
        v = qkv[:, 2 * E:]

        # scores = q @ k^T without materializing k.T (contract last dims).
        scores = lax.dot_general(
            q, k,
            dimension_numbers=(((1,), (1,)), ((), ())),
            preferred_element_type=jnp.float32,
        )                                                    # (bs, bs)
        m = jnp.max(scores, axis=-1, keepdims=True)
        p = jnp.exp(scores - m)
        denom = jnp.sum(p, axis=-1, keepdims=True)
        attn = p * pl.reciprocal(denom, approx=True)         # EUP slot
        ctx = jnp.dot(attn, v, preferred_element_type=jnp.float32)   # (bs, E)

        # Fused out_proj + classifier head (bf16 weight, f32 accumulation).
        out = jnp.dot(ctx.astype(jnp.bfloat16), wf_ref[...],
                      preferred_element_type=jnp.float32) + bf_ref[...]
        out_ref[...] = out.astype(out_ref.dtype)


# --------------------------------------------------------------------------- #
# Parameter prep (done ONCE, not per forward call)
# --------------------------------------------------------------------------- #
def init_params(key, channels, classes):
    """Deterministic synthetic params matching nn.MultiheadAttention + Linear shapes."""
    E = channels
    ks = jax.random.split(key, 10)
    wq = jax.random.normal(ks[0], (E, E), jnp.float32) * (1.0 / math.sqrt(E))
    wk = jax.random.normal(ks[1], (E, E), jnp.float32) * (1.0 / math.sqrt(E))
    wv = jax.random.normal(ks[2], (E, E), jnp.float32) * (1.0 / math.sqrt(E))
    bq = jax.random.normal(ks[3], (E,), jnp.float32) * 0.02
    bk = jax.random.normal(ks[4], (E,), jnp.float32) * 0.02
    bv = jax.random.normal(ks[5], (E,), jnp.float32) * 0.02
    wo = jax.random.normal(ks[6], (E, E), jnp.float32) * (1.0 / math.sqrt(E))
    bo = jax.random.normal(ks[7], (E,), jnp.float32) * 0.02
    wl = jax.random.normal(ks[8], (classes, E), jnp.float32) * (1.0 / math.sqrt(E))
    bl = jax.random.normal(ks[9], (classes,), jnp.float32) * 0.02
    return dict(wq=wq, wk=wk, wv=wv, bq=bq, bk=bk, bv=bv, wo=wo, bo=bo, wl=wl, bl=bl)


def prepare_params(params, channels, classes, lane_pad=128):
    """One-time algebraic fusion + layout/dtype prep (no per-call transposes)."""
    E = channels
    scale = 1.0 / math.sqrt(E)

    # Fused QKV in-projection, softmax scale folded into the Q columns.
    wqkv = jnp.concatenate(
        [params["wq"].T * scale, params["wk"].T, params["wv"].T], axis=1)   # (E, 3E)
    bqkv = jnp.concatenate(
        [params["bq"] * scale, params["bk"], params["bv"]]).reshape(1, 3 * E)

    # Fold out_proj into the classifier:
    #   (ctx @ Wo^T + bo) @ Wl^T + bl == ctx @ (Wo^T Wl^T) + (bo Wl^T + bl)
    wf = params["wo"].T @ params["wl"].T                     # (E, classes)
    bf = params["bo"] @ params["wl"].T + params["bl"]        # (classes,)

    # Pad classifier lanes to a multiple of 128 (lane-dense output store).
    cp = max(lane_pad, ((classes + lane_pad - 1) // lane_pad) * lane_pad)
    wf = jnp.pad(wf, ((0, 0), (0, cp - classes)))
    bf = jnp.pad(bf, (0, cp - classes)).reshape(1, cp)

    prepped = dict(
        wqkv=wqkv.astype(jnp.bfloat16),
        bqkv=bqkv.astype(jnp.float32),
        wf=wf.astype(jnp.bfloat16),
        bf=bf.astype(jnp.float32),
    )
    return prepped, cp


def _choose_k_tile(E, budget_bytes=16 * 1024 * 1024):
    """K-tile for streaming the (tk, 3E) bf16 weight slab, double-buffered."""
    if E % 128 != 0:
        return E                                   # tiny / ragged E: single tile
    per_row_bytes = 2 * 3 * E * 2                  # 2 buffers x (tk,3E) bf16
    tk_cap = max(128, (budget_bytes // per_row_bytes) // 128 * 128)
    tk = min(E, 512, tk_cap)
    tk = max(128, tk - (tk % 128))
    while E % tk != 0:
        tk -= 128
    return tk


# --------------------------------------------------------------------------- #
# Forward wrapper
# --------------------------------------------------------------------------- #
def self_attention_forward(x, prepped, channels, classes, classes_padded):
    """NCHW glue + pallas_call. All compute happens in the kernel."""
    bs = x.shape[0]
    E = channels
    cp = classes_padded
    x_flat = x.reshape(bs, -1).astype(jnp.float32)           # (bs, E)

    tk = _choose_k_tile(E)
    nk = E // tk

    grid_spec = pltpu.PrefetchScalarGridSpec(
        num_scalar_prefetch=0,
        grid=(nk,),
        in_specs=[
            pl.BlockSpec((bs, tk), lambda k: (0, k)),        # x K-slice
            pl.BlockSpec((tk, 3 * E), lambda k: (k, 0)),     # streamed Wqkv tile
            pl.BlockSpec((1, 3 * E), lambda k: (0, 0)),      # bqkv (resident)
            pl.BlockSpec((E, cp), lambda k: (0, 0)),         # fused head weight
            pl.BlockSpec((1, cp), lambda k: (0, 0)),         # fused head bias
        ],
        out_specs=pl.BlockSpec((bs, cp), lambda k: (0, 0)),
        scratch_shapes=[pltpu.VMEM((bs, 3 * E), jnp.float32)],
    )

    out_padded = pl.pallas_call(
        functools.partial(self_attention_kernel, embed_dim=E),
        out_shape=jax.ShapeDtypeStruct((bs, cp), jnp.float32),
        grid_spec=grid_spec,
        compiler_params=pltpu.CompilerParams(
            dimension_semantics=("arbitrary",)),             # K is a reduction axis
    )(x_flat, prepped["wqkv"], prepped["bqkv"], prepped["wf"], prepped["bf"])

    return out_padded[:, :classes]


# --------------------------------------------------------------------------- #
# References
# --------------------------------------------------------------------------- #
def reference_forward_f32(x, params, classes):
    """PyTorch-faithful pure-f32 reference."""
    bs = x.shape[0]
    xf = x.reshape(bs, -1).astype(jnp.float32)
    E = xf.shape[1]
    q = xf @ params["wq"].T + params["bq"]
    k = xf @ params["wk"].T + params["bk"]
    v = xf @ params["wv"].T + params["bv"]
    scores = (q / math.sqrt(E)) @ k.T
    attn = jax.nn.softmax(scores, axis=-1)
    ctx = attn @ v
    attn_out = ctx @ params["wo"].T + params["bo"]
    return attn_out @ params["wl"].T + params["bl"]


def reference_forward_matched(x, prepped, channels, classes):
    """Same math with the kernel's precision choices (checks kernel numerics)."""
    bs = x.shape[0]
    E = channels
    xf = x.reshape(bs, -1).astype(jnp.float32)
    xb = xf.astype(jnp.bfloat16).astype(jnp.float32)
    wqkv = prepped["wqkv"].astype(jnp.float32)
    qkv = xb @ wqkv + prepped["bqkv"]
    q, k, v = qkv[:, :E], qkv[:, E:2 * E], qkv[:, 2 * E:]
    attn = jax.nn.softmax(q @ k.T, axis=-1)
    ctx = attn @ v
    ctxb = ctx.astype(jnp.bfloat16).astype(jnp.float32)
    out = ctxb @ prepped["wf"].astype(jnp.float32) + prepped["bf"]
    return out[:, :classes]


# --------------------------------------------------------------------------- #
if __name__ == "__main__":
    # Small shapes: bs=8, C=2, H=W=4 -> embed dim E = 32, classes = 8.
    bs, C, H, W = 8, 2, 4, 4
    channels = C * H * W
    classes = 8

    key = jax.random.PRNGKey(0)
    kx, kp = jax.random.split(key)
    x = jax.random.normal(kx, (bs, C, H, W), jnp.float32)
    params = init_params(kp, channels, classes)

    prepped, classes_padded = prepare_params(params, channels, classes)

    out = self_attention_forward(x, prepped, channels, classes, classes_padded)
    out = jax.block_until_ready(out)
    assert out.shape == (bs, classes), out.shape

    # Tight check against a reference using the same precision choices.
    ref_matched = reference_forward_matched(x, prepped, channels, classes)
    assert jnp.allclose(out, ref_matched, rtol=1e-2, atol=1e-2), \
        "mismatch vs precision-matched reference"

    # Looser sanity check against the PyTorch-faithful f32 reference
    # (difference is the intentional bf16 weight rounding).
    ref_f32 = reference_forward_f32(x, params, classes)
    assert jnp.allclose(out, ref_f32, rtol=5e-2, atol=5e-2), \
        "mismatch vs f32 reference"

    print("KERNEL_OK")
</pallas_src>

<mosaic_0001>
module attributes {stable_mosaic.version = 11 : i64} {
  func.func @self_attention_kernel(%arg0: i32, %arg1: memref<8x32xf32, #tpu.memory_space<vmem>>, %arg2: memref<32x96xbf16, #tpu.memory_space<vmem>>, %arg3: memref<1x96xf32, #tpu.memory_space<vmem>>, %arg4: memref<32x128xbf16, #tpu.memory_space<vmem>>, %arg5: memref<1x128xf32, #tpu.memory_space<vmem>>, %arg6: memref<8x128xf32, #tpu.memory_space<vmem>>, %arg7: memref<8x96xf32, #tpu.memory_space<vmem>>) attributes {dimension_semantics = [#tpu.dimension_semantics<arbitrary>], iteration_bounds = array<i64: 1>, scalar_prefetch = 0 : i64, scratch_operands = 1 : i64, tpu.core_type = #tpu.core_type<tc>, window_params = [{transform_indices = @transform_0, window_bounds = array<i64: 8, 32>}, {transform_indices = @transform_1, window_bounds = array<i64: 32, 96>}, {pipeline_mode = #tpu.pipeline_mode<synchronous>, transform_indices = @transform_2, window_bounds = array<i64: 1, 96>}, {pipeline_mode = #tpu.pipeline_mode<synchronous>, transform_indices = @transform_3, window_bounds = array<i64: 32, 128>}, {pipeline_mode = #tpu.pipeline_mode<synchronous>, transform_indices = @transform_4, window_bounds = array<i64: 1, 128>}, {pipeline_mode = #tpu.pipeline_mode<synchronous>, transform_indices = @transform_5, window_bounds = array<i64: 8, 128>}]} {
    %c0_i32 = arith.constant 0 : i32
    %0 = arith.cmpi eq, %arg0, %c0_i32 : i32
    %1 = arith.extui %0 : i1 to i32
    %c0_i32_0 = arith.constant 0 : i32
    %2 = arith.cmpi ne, %1, %c0_i32_0 : i32
    scf.if %2 {
      %cst_10 = arith.constant 0.000000e+00 : f32
      %13 = vector.broadcast %cst_10 : f32 to vector<8x96xf32>
      %c0_11 = arith.constant 0 : index
      %c0_12 = arith.constant 0 : index
      %14 = vector.load %arg7[%c0_11, %c0_12] : memref<8x96xf32, #tpu.memory_space<vmem>>, vector<8x96xf32>
      tpu.vector_store %arg7[%c0_11, %c0_12], %13 {strides = array<i32>} : memref<8x96xf32, #tpu.memory_space<vmem>>, vector<8x96xf32>,
    } else {
    }
    %c0 = arith.constant 0 : index
    %c0_1 = arith.constant 0 : index
    %3 = vector.load %arg7[%c0, %c0_1] : memref<8x96xf32, #tpu.memory_space<vmem>>, vector<8x96xf32>
    %c0_2 = arith.constant 0 : index
    %c0_3 = arith.constant 0 : index
    %4 = vector.load %arg1[%c0_2, %c0_3] : memref<8x32xf32, #tpu.memory_space<vmem>>, vector<8x32xf32>
    %5 = arith.truncf %4 : vector<8x32xf32> to vector<8x32xbf16>
    %c0_4 = arith.constant 0 : index
    %c0_5 = arith.constant 0 : index
    %6 = vector.load %arg2[%c0_4, %c0_5] : memref<32x96xbf16, #tpu.memory_space<vmem>>, vector<32x96xbf16>
    %cst = arith.constant dense<0.000000e+00> : vector<8x96xf32>
    %7 = tpu.matmul %5, %6, %cst {dimension_numbers = #tpu.dot_dimension_numbers<[1], [0], [0], [1], [0, 0, 1, 1], [], []>} : vector<8x32xbf16>, vector<32x96xbf16>, vector<8x96xf32> -> vector<8x96xf32>
    %8 = arith.addf %3, %7 : vector<8x96xf32>
    %c0_6 = arith.constant 0 : index
    %c0_7 = arith.constant 0 : index
    %9 = vector.load %arg7[%c0_6, %c0_7] : memref<8x96xf32, #tpu.memory_space<vmem>>, vector<8x96xf32>
    tpu.vector_store %arg7[%c0_6, %c0_7], %8 {strides = array<i32>} : memref<8x96xf32, #tpu.memory_space<vmem>>, vector<8x96xf32>,
    %c0_i32_8 = arith.constant 0 : i32
    %10 = arith.cmpi eq, %arg0, %c0_i32_8 : i32
    %11 = arith.extui %10 : i1 to i32
    %c0_i32_9 = arith.constant 0 : i32
    %12 = arith.cmpi ne, %11, %c0_i32_9 : i32
    scf.if %12 {
      %c0_10 = arith.constant 0 : index
      %c0_11 = arith.constant 0 : index
      %13 = vector.load %arg7[%c0_10, %c0_11] : memref<8x96xf32, #tpu.memory_space<vmem>>, vector<8x96xf32>
      %c0_12 = arith.constant 0 : index
      %c0_13 = arith.constant 0 : index
      %14 = vector.load %arg3[%c0_12, %c0_13] : memref<1x96xf32, #tpu.memory_space<vmem>>, vector<1x96xf32>
      %15 = vector.broadcast %14 : vector<1x96xf32> to vector<8x96xf32>
      %16 = arith.addf %13, %15 : vector<8x96xf32>
      %17 = vector.extract_strided_slice %16 {offsets = [0, 0], sizes = [8, 32], strides = [1, 1]} : vector<8x96xf32> to vector<8x32xf32>
      %18 = vector.extract_strided_slice %16 {offsets = [0, 32], sizes = [8, 32], strides = [1, 1]} : vector<8x96xf32> to vector<8x32xf32>
      %19 = vector.extract_strided_slice %16 {offsets = [0, 64], sizes = [8, 32], strides = [1, 1]} : vector<8x96xf32> to vector<8x32xf32>
      %cst_14 = arith.constant dense<0.000000e+00> : vector<8x8xf32>
      %20 = tpu.matmul %17, %18, %cst_14 {dimension_numbers = #tpu.dot_dimension_numbers<[1], [1], [0], [0], [0, 0, 1, 0], [], []>} : vector<8x32xf32>, vector<8x32xf32>, vector<8x8xf32> -> vector<8x8xf32>
      %cst_15 = arith.constant dense<0xFF800000> : vector<8xf32>
      %21 = vector.multi_reduction <maximumf>, %20, %cst_15 [1] : vector<8x8xf32> to vector<8xf32>
      %22 = vector.shape_cast %21 : vector<8xf32> to vector<8x1xf32>
      %23 = vector.broadcast %22 : vector<8x1xf32> to vector<8x8xf32>
      %24 = arith.subf %20, %23 : vector<8x8xf32>
      %25 = math.exp %24 : vector<8x8xf32>
      %cst_16 = arith.constant dense<0.000000e+00> : vector<8xf32>
      %26 = vector.multi_reduction <add>, %25, %cst_16 [1] : vector<8x8xf32> to vector<8xf32>
      %27 = vector.shape_cast %26 : vector<8xf32> to vector<8x1xf32>
      %28 = tpu.reciprocal %27 {approx = true} : vector<8x1xf32> -> vector<8x1xf32>
      %29 = vector.broadcast %28 : vector<8x1xf32> to vector<8x8xf32>
      %30 = arith.mulf %25, %29 : vector<8x8xf32>
      %cst_17 = arith.constant dense<0.000000e+00> : vector<8x32xf32>
      %31 = tpu.matmul %30, %19, %cst_17 {dimension_numbers = #tpu.dot_dimension_numbers<[1], [0], [0], [1], [0, 0, 1, 1], [], []>} : vector<8x8xf32>, vector<8x32xf32>, vector<8x32xf32> -> vector<8x32xf32>
      %32 = arith.truncf %31 : vector<8x32xf32> to vector<8x32xbf16>
      %c0_18 = arith.constant 0 : index
      %c0_19 = arith.constant 0 : index
      %33 = vector.load %arg4[%c0_18, %c0_19] : memref<32x128xbf16, #tpu.memory_space<vmem>>, vector<32x128xbf16>
      %cst_20 = arith.constant dense<0.000000e+00> : vector<8x128xf32>
      %34 = tpu.matmul %32, %33, %cst_20 {dimension_numbers = #tpu.dot_dimension_numbers<[1], [0], [0], [1], [0, 0, 1, 1], [], []>} : vector<8x32xbf16>, vector<32x128xbf16>, vector<8x128xf32> -> vector<8x128xf32>
      %c0_21 = arith.constant 0 : index
      %c0_22 = arith.constant 0 : index
      %35 = vector.load %arg5[%c0_21, %c0_22] : memref<1x128xf32, #tpu.memory_space<vmem>>, vector<1x128xf32>
      %36 = vector.broadcast %35 : vector<1x128xf32> to vector<8x128xf32>
      %37 = arith.addf %34, %36 : vector<8x128xf32>
      %c0_23 = arith.constant 0 : index
      %c0_24 = arith.constant 0 : index
      %38 = vector.load %arg6[%c0_23, %c0_24] : memref<8x128xf32, #tpu.memory_space<vmem>>, vector<8x128xf32>
      tpu.vector_store %arg6[%c0_23, %c0_24], %37 {strides = array<i32>} : memref<8x128xf32, #tpu.memory_space<vmem>>, vector<8x128xf32>,
    } else {
    }
    return
  }
  func.func @transform_0(%arg0: i32) -> (i32, i32) {
    %c0_i32 = arith.constant 0 : i32
    %c0_i32_0 = arith.constant 0 : i32
    return %c0_i32, %arg0 : i32, i32
  }
  func.func @transform_1(%arg0: i32) -> (i32, i32) {
    %c0_i32 = arith.constant 0 : i32
    %c0_i32_0 = arith.constant 0 : i32
    return %arg0, %c0_i32 : i32, i32
  }
  func.func @transform_2(%arg0: i32) -> (i32, i32) {
    %c0_i32 = arith.constant 0 : i32
    %c0_i32_0 = arith.constant 0 : i32
    %c0_i32_1 = arith.constant 0 : i32
    return %c0_i32, %c0_i32_0 : i32, i32
  }
  func.func @transform_3(%arg0: i32) -> (i32, i32) {
    %c0_i32 = arith.constant 0 : i32
    %c0_i32_0 = arith.constant 0 : i32
    %c0_i32_1 = arith.constant 0 : i32
    return %c0_i32, %c0_i32_0 : i32, i32
  }
  func.func @transform_4(%arg0: i32) -> (i32, i32) {
    %c0_i32 = arith.constant 0 : i32
    %c0_i32_0 = arith.constant 0 : i32
    %c0_i32_1 = arith.constant 0 : i32
    return %c0_i32, %c0_i32_0 : i32, i32
  }
  func.func @transform_5(%arg0: i32) -> (i32, i32) {
    %c0_i32 = arith.constant 0 : i32
    %c0_i32_0 = arith.constant 0 : i32
    %c0_i32_1 = arith.constant 0 : i32
    return %c0_i32, %c0_i32_0 : i32, i32
  }
}

</mosaic_0001>

<bundles_post_ra>
// kernel: tpu_custom_call.1
= control target key start
LH: loop header
LB: loop body
LE: loop exit
PB: predicated region body
PF: predicated region fallthrough
CT: control target
= control target key end

     0   :  { %10 = vsyncpa [#allocation4], 0  ;;  %s665_s0 = inlined_call_operand.hbm [shape: f32[8,32], index: 0, kind: input, shape index: {}]   ;;  %s666_s1 = inlined_call_operand.hbm [shape: bf16[32,96], index: 1, kind: input, shape index: {}]   ;;  %s667_s2 = inlined_call_operand.vmem [shape: f32[1,96], index: 2, kind: input, shape index: {}]   ;;  %s668_s3 = inlined_call_operand.hbm [shape: bf16[32,128], index: 3, kind: input, shape index: {}]   ;;  %s669_s4 = inlined_call_operand.vmem [shape: f32[1,128], index: 4, kind: input, shape index: {}]   ;;  %s670_s5 = inlined_call_operand.hbm [shape: f32[8,128], index: 5, kind: output, shape index: {}]  }
   0x1   :  { %11 = vsyncpa [#allocation7], 0 }
   0x2   :  { %12 = vsyncpa [#allocation5], 0  ;;  %s552_s18 = smov [#allocation6]   ;;  %s458_s22 = scalar_lea.hbm %s666_s1, 256 }
   0x3   :  { %s28_s19 = sshll.u32 %s552_s18, 4  ;;  %p459_p0 = scmp.ne.s32.totalorder %s666_s1, %s458_s22  ;;  %s29_s19 = int_to_ptr.vmem [resolvable:$true] %s28_s19 }
   0x4   :  { %p462_p1 = scmp.lt.u32.totalorder %s458_s22, %s666_s1 }
   0x6   :  { %p464_p2 = pnand %p462_p1, %p459_p0 }
   0x8   :  { %467 = shalt.err (!%p464_p2)
}
   0x9   :  { %s468_s27 = scalar_lea.vmem %s29_s19, 256  ;;  %p473_p4 = scmp.lt.s32.totalorder %s29_s19, %s29_s19 }
   0xa   :  { %p469_p3 = scmp.ne.s32.totalorder %s29_s19, %s468_s27  ;;  %p474_p5 = scmp.lt.s32.totalorder %s468_s27, %s468_s27 }
   0xc   :  { %p475_p6 = por %p474_p5, %p473_p4 }
   0xe   :  { %p476_p7 = pnand %p475_p6, %p469_p3 }
  0x10   :  { %479 = shalt.err (!%p476_p7)
}
  0x11   :  { %s553_s28 = smov 64   ;;  %s554_s29 = smov 4  }
  0x12   :  { %34 = dma.hbm_to_vmem [thread:$0]  %s666_s1, 256, %s29_s19, [#allocation7], %s553_s28, %s553_s28, %s554_s29  }
  0x13   :  { %s555_s7 = smov [#allocation3]   ;;  %s556_s9 = smov [#allocation8]  }
  0x14   :  { %s19_s8 = sshll.u32 %s555_s7, 4  ;;  %s42_s10 = sshll.u32 %s556_s9, 4  ;;  %s20_s8 = int_to_ptr.vmem [resolvable:$true] %s19_s8  ;;  %s43_s10 = int_to_ptr.vmem [resolvable:$true] %s42_s10 }
  0x15   :  { %s480_s13 = scalar_lea.hbm %s665_s0, 128 }
  0x16   :  { %p481_p8 = scmp.ne.s32.totalorder %s665_s0, %s480_s13  ;;  %p484_p9 = scmp.lt.u32.totalorder %s480_s13, %s665_s0 }
  0x18   :  { %p486_p10 = pnand %p484_p9, %p481_p8 }
  0x1a   :  { %489 = shalt.err (!%p486_p10)
}
  0x1b   :  { %s490_s1 = scalar_lea.vmem %s20_s8, 128  ;;  %p495_p12 = scmp.lt.s32.totalorder %s20_s8, %s20_s8 }
  0x1c   :  { %p491_p11 = scmp.ne.s32.totalorder %s20_s8, %s490_s1  ;;  %p496_p13 = scmp.lt.s32.totalorder %s490_s1, %s490_s1 }
  0x1e   :  { %p497_p0 = por %p496_p13, %p495_p12 }
  0x20   :  { %p498_p1 = pnand %p497_p0, %p491_p11 }
  0x22   :  { %501 = shalt.err (!%p498_p1)
}
  0x23   :  { %22 = dma.hbm_to_vmem [thread:$0]  %s665_s0, 128, %s20_s8, [#allocation4]  }
  0x24   :  { %s502_s22 = scalar_lea.hbm %s668_s3, 256 }
  0x25   :  { %p503_p2 = scmp.ne.s32.totalorder %s668_s3, %s502_s22  ;;  %p506_p3 = scmp.lt.u32.totalorder %s502_s22, %s668_s3 }
  0x27   :  { %p508_p4 = pnand %p506_p3, %p503_p2 }
  0x29   :  { %511 = shalt.err (!%p508_p4)
}
  0x2a   :  { %s512_s27 = scalar_lea.vmem %s43_s10, 256  ;;  %p517_p6 = scmp.lt.s32.totalorder %s43_s10, %s43_s10 }
  0x2b   :  { %p513_p5 = scmp.ne.s32.totalorder %s43_s10, %s512_s27  ;;  %p518_p7 = scmp.lt.s32.totalorder %s512_s27, %s512_s27 }
  0x2d   :  { %p519_p8 = por %p518_p7, %p517_p6 }
  0x2f   :  { %p520_p9 = pnand %p519_p8, %p513_p5 }
  0x31   :  { %523 = shalt.err (!%p520_p9)
}
  0x32   :  { %48 = dma.hbm_to_vmem [thread:$0]  %s668_s3, 256, %s43_s10, [#allocation7], %s553_s28, %s553_s28, %s554_s29  }
  0x33   :  { %546 = dma.done.wait [#allocation4], 128  }
  0x34   :  { %547 = vsyncadd [#allocation4], 4294967168 }
  0x35   :  { %548 = dma.done.wait [#allocation7], 512  }
  0x36   :  { %549 = vsyncadd [#allocation7], 4294966784  ;;  %vm65_vm0 = vcmask 785408   ;;  %v557_v0 = vmov 0.0   ;;  %vm558_vm1 = vmmov 0   ;;  %v450_v1 = vld [vmem:[#allocation6] sm:$0xff]  }
  0x37   :  { %415 = vmatprep.subr.bf16.mxu0 %v557_v0  ;;  %419 = vmatprep.mubr.msk.bf16.mxu0 %vm558_vm1, %v557_v0  ;;  %66 = vst.msk [vmem:[#allocation2] sm:$0xff] %vm65_vm0, %v557_v0  ;;  %v451_v2 = vld [vmem:[#allocation6 + $0x8] sm:$0xff]   ;;  %v68_v3 = vld [vmem:[#allocation3] sm:$0xff]  ;;  %vm86_vm2 = vcmask 261120   ;;  %v397_v11 = vld [vmem:[%s667_s2] ss:$0 sm:$0xff] }
  0x38   :  { %423 = vmatprep.subr.mxu1 %v557_v0  ;;  %425 = vmatprep.mubr.msk.f32.mxu1 %vm558_vm1, %v557_v0  ;;  %v69_v4 = vpack.c.bf16 %v68_v3, %v68_v3  ;;  %s559_s6 = smov 96   ;;  %vm222_vm3 = vcmask 64512   ;;  %v452_v23 = vld [vmem:[#allocation8] sm:$0xff]   ;;  %v453_v24 = vld [vmem:[#allocation8 + $0x8] sm:$0xff]   ;;  %s560_s7 = smov [#allocation9]  }
  0x39   :  { %416 = vmatpush3.bf16.msra.mxu0 %v450_v1  ;;  %v401_v32 = vld [vmem:[%s669_s4] ss:$0 sm:$0xff]  ;;  %s384_s8 = sshll.u32 %s560_s7, 4  ;;  %s385_s8 = int_to_ptr.vmem [resolvable:$true] %s384_s8 }
  0x3a   :  { %417 = vmatprep.subr.bf16.mxu0 %v557_v0  ;;  %s524_s9 = scalar_lea.vmem %s385_s8, 128  ;;  %p529_p11 = scmp.lt.s32.totalorder %s385_s8, %s385_s8 }
  0x3b   :  { %p525_p10 = scmp.ne.s32.totalorder %s385_s8, %s524_s9  ;;  %p530_p12 = scmp.lt.s32.totalorder %s524_s9, %s524_s9 }
  0x3d   :  { %418 = vmatpush3.bf16.msra.mxu0 %v451_v2  ;;  %p531_p13 = por %p530_p12, %p529_p11 }
  0x3e   :  { %433 = vmatprep.subr.bf16.mxu0 %v557_v0  ;;  %v67_v5 = vld [vmem:[#allocation2] sm:$0xff] }
  0x3f   :  { %p532_p0 = pnand %p531_p13, %p525_p10 }
  0x40   :  { %420 = vmatmul.mubr.msk.bf16.vlgmr.msra.gmra.mrb[0].mxu0 %vm86_vm2, %v69_v4 }
  0x41   :  { %437 = vmatprep.mubr.msk.bf16.mxu0 %vm558_vm1, %v557_v0  ;;  %434 = vmatpush3.bf16.msra.mxu0 %v452_v23 }
  0x42   :  { %435 = vmatprep.subr.bf16.mxu0 %v557_v0 }
  0x45   :  { %436 = vmatpush3.bf16.msra.mxu0 %v453_v24 }
 0x113   :  { %v124_v6 = vpop.f32.mrb[0].mxu0 }
 0x114   :  { %v130_v7 = vadd.f32 %v124_v6, %v67_v5  ;;  %v421_v8 = vpop.f32.mrb[1].mxu0 }
 0x115   :  { %v127_v9 = vpop.f32.mrb[2].mxu0 }
 0x116   :  { %132 = vst.msk [vmem:[#allocation2] sm:$0xff] %vm65_vm0, %v130_v7  ;;  %v422_v10 = vpop.f32.mrb[3].mxu0 }
 0x11d   :  { %v136_v12 = vld [vmem:[#allocation2] sm:$0xff] }
 0x11e   :  { %v144_v13 = vadd.f32 %v397_v11, %v136_v12 }
 0x120   :  { %146 = vrot.lane.b32.xlu0 %v144_v13, %s559_s6 }
 0x192   :  { %v147_v14 = vpop.permute.xlu0 %146 }
 0x193   :  { %424 = vmatpush3.xpose.msk.msra.mxu1 %vm86_vm2, %v147_v14 }
 0x194   :  { %428 = vmatprep.subr.mxu1 %v557_v0 }
 0x196   :  { %426 = vmatmul.mubr.msk.f32.vlgmr.msra.gmra.mrb[0].mxu1 %vm86_vm2, %v144_v13 }
 0x197   :  { %430 = vmatprep.mubr.msk.f32.mxu1 %vm558_vm1, %v557_v0 }
 0x269   :  { %v218_v15 = vpop.f32.mrb[0].mxu1 }
 0x26a   :  { %v427_v16 = vpop.f32.mrb[1].mxu1  ;;  %v223_v17 = vsel %vm222_vm3, %v218_v15, -inf }
 0x26b   :  { %224 = vmax.xlane.f32.xlu0 %v223_v17 }
 0x2f8   :  { %v225_v18 = vpop.xlane.xlu0 %224 }
 0x2f9   :  { %v226_v19 = vsub.f32 %v218_v15, %v225_v18 }
 0x2fb   :  { %v227_v20 = vmul.f32 1.442695, %v226_v19 }
 0x2fd   :  { %454 = vpow2.f32 %v227_v20 }
 0x307   :  { %v455_v21 = vpop.eup %454 }
 0x308   :  { %v229_v22 = vsel %vm222_vm3, %v455_v21, 0.0 }
 0x309   :  { %230 = vadd.xlane.f32.xlu1 %v229_v22 }
 0x31a   :  { %234 = vrot.lane.b32.xlu1 %v144_v13, %s553_s28 }
 0x396   :  { %v231_v25 = vpop.xlane.xlu1 %230 }
 0x397   :  { %456 = vrcp.f32 %v231_v25 }
 0x39a   :  { %v235_v26 = vpop.permute.xlu1 %234 }
 0x39b   :  { %429 = vmatpush3.msra.mxu1 %v235_v26 }
 0x3a1   :  { %v457_v27 = vpop.eup %456 }
 0x3a2   :  { %v233_v28 = vmul.f32 %v457_v27, %v455_v21 }
 0x3a4   :  { %431 = vmatmul.mubr.msk.f32.vlgmr.msra.gmra.mrb[2].mxu1 %vm222_vm3, %v233_v28 }
 0x477   :  { %v306_v29 = vpop.f32.mrb[2].mxu1 }
 0x478   :  { %v310_v30 = vpack.c.bf16 %v306_v29, %v306_v29  ;;  %v432_v31 = vpop.f32.mrb[3].mxu1 }
 0x47a   :  { %438 = vmatmul.mubr.msk.bf16.vlgmr.msra.gmra.mrb[4].mxu0 %vm86_vm2, %v310_v30 }
 0x54d   :  { %v371_v33 = vpop.f32.mrb[4].mxu0 }
 0x54e   :  { %v372_v34 = vadd.f32 %v401_v32, %v371_v33  ;;  %v439_v35 = vpop.f32.mrb[5].mxu0 }
 0x54f   :  { %v374_v36 = vpop.f32.mrb[6].mxu0 }
 0x550   :  { %377 = vst [vmem:[#allocation9] sm:$0xff] %v372_v34  ;;  %v440_v37 = vpop.f32.mrb[7].mxu0 }
 0x551   :  { %535 = shalt.err (!%p532_p0)
}
 0x552   :  { %s536_s4 = scalar_lea.hbm %s670_s5, 128 }
 0x553   :  { %p537_p1 = scmp.ne.s32.totalorder %s670_s5, %s536_s4  ;;  %p540_p2 = scmp.lt.u32.totalorder %s536_s4, %s670_s5 }
 0x555   :  { %p542_p3 = pnand %p540_p2, %p537_p1 }
 0x557   :  { %545 = shalt.err (!%p542_p3)
}
 0x558   :  { %387 = dma.vmem_to_hbm [thread:$0]  %s385_s8, 128, %s670_s5, [#allocation5]  }
 0x559   :  { %550 = dma.done.wait [#allocation5], 128  }
 0x55a   :  { %551 = vsyncadd [#allocation5], 4294967168 }
 0x55b   :  { %391 = vsyncpa [#allocation4], 1 }
 0x55c   :  { %392 = vsyncpa [#allocation7], 1 }
 0x55d   :  { %393 = vsyncpa [#allocation5], 1 }

</bundles_post_ra>
